<compile_context>
chip_gen: v7x
topology: tpu7x:2x2x1
jax: 0.10.0
libtpu: 0.0.40
codegen_flags: <defaults>
</compile_context>

<pallas_src>
import functools

import numpy as np
import jax
import jax.numpy as jnp
from jax.experimental import pallas as pl
from jax.experimental.pallas import tpu as pltpu

BN_EPS = 1e-5


# --------------------------------------------------------------------------
# Kernel: fused multi-hot @ block-diagonal-table matmul + folded-BN FMA
# --------------------------------------------------------------------------
def _tab_input_kernel(x_cat_ref, x_cont_ref, scale_ref, shift_ref, table_ref,
                      o_ref, *, n_cat, d_out, d_pad):
    tb = x_cat_ref.shape[0]
    vocab = table_ref.shape[0]

    # --- embedding gather: one multi-hot built from a SINGLE iota, one MXU dot
    idx = x_cat_ref[...]                                     # (tb, n_cat), offsets folded in
    iota = jax.lax.broadcasted_iota(jnp.int32, (tb, vocab), 1)
    hit = iota == idx[:, 0:1]
    for c in range(1, n_cat):
        hit = jnp.logical_or(hit, iota == idx[:, c:c + 1])
    multihot = hit.astype(table_ref.dtype)                   # bf16 MXU operand (exact 0/1)
    emb = jnp.dot(multihot, table_ref[...],
                  preferred_element_type=jnp.float32)        # (tb, d_emb) f32 accum

    # --- Dropout(emb_drop=0.0) is a no-op.

    # --- folded BatchNorm1d: single FMA (scale/shift precomputed in wrapper)
    cont = (x_cont_ref[...].astype(jnp.float32) * scale_ref[...]
            + shift_ref[...])                                # (tb, n_cont) f32

    pieces = [emb, cont]
    if d_pad > d_out:
        pieces.append(jnp.zeros((tb, d_pad - d_out), jnp.float32))
    # single lane-dense (d_pad = multiple of 128) unmasked store of the whole tile
    o_ref[...] = jnp.concatenate(pieces, axis=1).astype(o_ref.dtype)


# --------------------------------------------------------------------------
# Wrapper
# --------------------------------------------------------------------------
def _pick_batch_tile(batch, tb_max):
    """Largest multiple of 8 that divides batch and is <= tb_max (else full batch)."""
    cands = [d for d in range(8, min(tb_max, batch) + 1, 8) if batch % d == 0]
    return max(cands) if cands else batch


def tab_input_block(x_cat, x_cont, emb_tables, gamma, beta, *,
                    tb=512, table_dtype=jnp.bfloat16):
    """x_cat: (B, n_cat) int; x_cont: (B, n_cont) f32;
    emb_tables: list of (ni_i, nf_i) f32; gamma/beta: (n_cont,) f32."""
    B, n_cat = x_cat.shape
    n_cont = x_cont.shape[1]
    assert n_cat == len(emb_tables) and n_cat > 0 and n_cont > 0

    vocab_sizes = [int(t.shape[0]) for t in emb_tables]
    emb_dims = [int(t.shape[1]) for t in emb_tables]
    total_vocab = sum(vocab_sizes)
    d_emb = sum(emb_dims)
    d_out = d_emb + n_cont
    d_pad = ((d_out + 127) // 128) * 128          # lane-dense output width

    # ---- block-diagonal fused table + cumulative vocab offsets (host-side, once)
    row_off = np.concatenate([[0], np.cumsum(vocab_sizes)[:-1]]).astype(np.int32)
    col_off = np.concatenate([[0], np.cumsum(emb_dims)[:-1]]).astype(np.int32)
    fused = jnp.zeros((total_vocab, d_emb), jnp.float32)
    for t, ro, co in zip(emb_tables, row_off, col_off):
        fused = fused.at[ro:ro + t.shape[0], co:co + t.shape[1]].set(
            t.astype(jnp.float32))
    fused = fused.astype(table_dtype)
    x_cat_off = x_cat.astype(jnp.int32) + jnp.asarray(row_off, jnp.int32)[None, :]

    # ---- folded BatchNorm1d (training-mode batch stats, biased variance) with
    # plain XLA: a tiny mem-bound reduce, not worth its own Pallas launch.
    xc = x_cont.astype(jnp.float32)
    mean = jnp.mean(xc, axis=0, keepdims=True)
    var = jnp.mean(jnp.square(xc - mean), axis=0, keepdims=True)   # two-pass, stable
    scale = gamma.reshape(1, n_cont).astype(jnp.float32) * jax.lax.rsqrt(var + BN_EPS)
    shift = beta.reshape(1, n_cont).astype(jnp.float32) - mean * scale

    # ---- tiling
    tb = _pick_batch_tile(B, tb)
    n_tiles = B // tb

    const_buf = pl.Buffered(1)   # grid-invariant inputs: no double-buffering (VMEM)
    in_specs = [
        pl.BlockSpec((tb, n_cat), lambda i: (i, 0)),
        pl.BlockSpec((tb, n_cont), lambda i: (i, 0)),
        pl.BlockSpec((1, n_cont), lambda i: (0, 0), pipeline_mode=const_buf),
        pl.BlockSpec((1, n_cont), lambda i: (0, 0), pipeline_mode=const_buf),
        pl.BlockSpec((total_vocab, d_emb), lambda i: (0, 0),
                     pipeline_mode=const_buf),
    ]

    out_dtype = x_cont.dtype
    flops = 2 * B * total_vocab * d_emb + 2 * B * n_cont
    bytes_accessed = (4 * B * n_cat + 4 * B * n_cont
                      + jnp.dtype(out_dtype).itemsize * B * d_pad
                      + jnp.dtype(table_dtype).itemsize * total_vocab * d_emb
                      + 8 * n_cont)

    out_padded = pl.pallas_call(
        functools.partial(_tab_input_kernel, n_cat=n_cat, d_out=d_out,
                          d_pad=d_pad),
        out_shape=jax.ShapeDtypeStruct((B, d_pad), out_dtype),
        grid=(n_tiles,),
        in_specs=in_specs,
        out_specs=pl.BlockSpec((tb, d_pad), lambda i: (i, 0)),
        compiler_params=pltpu.CompilerParams(
            dimension_semantics=("parallel",),          # useful on v7x (2 TCs)
            vmem_limit_bytes=48 * 1024 * 1024),
        cost_estimate=pl.CostEstimate(flops=int(flops), transcendentals=0,
                                      bytes_accessed=int(bytes_accessed)),
    )(x_cat_off, x_cont, scale, shift, fused)

    return out_padded[:, :d_out] if d_pad != d_out else out_padded


# --------------------------------------------------------------------------
# Pure-JAX reference (same training-mode BN semantics, f32 tables)
# --------------------------------------------------------------------------
def tab_input_block_ref(x_cat, x_cont, emb_tables, gamma, beta):
    embs = [t[x_cat[:, i]] for i, t in enumerate(emb_tables)]
    x = jnp.concatenate(embs, axis=1)
    mean = jnp.mean(x_cont, axis=0, keepdims=True)
    var = jnp.mean((x_cont - mean) ** 2, axis=0, keepdims=True)
    xc = (x_cont - mean) / jnp.sqrt(var + BN_EPS) * gamma + beta
    return jnp.concatenate([x, xc], axis=1)


if __name__ == "__main__":
    key = jax.random.PRNGKey(0)
    k_cat, k_cont, k_g, k_b, k_e = jax.random.split(key, 5)

    B = 256                                   # 2 batch tiles of 128 (>= 2 for v7x)
    emb_sz = [(10, 6), (7, 4), (5, 3)]        # (vocab, embed_dim) per categorical col
    n_cont = 4

    # categorical indices, one column per embedding table
    cat_cols = []
    for i, (ni, _nf) in enumerate(emb_sz):
        kk = jax.random.fold_in(k_cat, i)
        cat_cols.append(jax.random.randint(kk, (B,), 0, ni, dtype=jnp.int32))
    x_cat = jnp.stack(cat_cols, axis=1)       # (B, n_cat) int32

    x_cont = jax.random.normal(k_cont, (B, n_cont), dtype=jnp.float32)

    # embedding tables (trunc-normal-ish init, std=0.01 as in the module)
    emb_tables = []
    for i, (ni, nf) in enumerate(emb_sz):
        kk = jax.random.fold_in(k_e, i)
        emb_tables.append(0.01 * jax.random.normal(kk, (ni, nf),
                                                   dtype=jnp.float32))

    # BatchNorm affine params (perturbed so the affine path is exercised)
    gamma = 1.0 + 0.1 * jax.random.normal(k_g, (n_cont,), dtype=jnp.float32)
    beta = 0.1 * jax.random.normal(k_b, (n_cont,), dtype=jnp.float32)

    out = tab_input_block(x_cat, x_cont, emb_tables, gamma, beta, tb=128)
    out = jax.block_until_ready(out)

    ref = tab_input_block_ref(x_cat, x_cont, emb_tables, gamma, beta)
    d_out = sum(nf for _, nf in emb_sz) + n_cont
    assert out.shape == (B, d_out)
    # bf16 table rounding on ~0.01-scale weights => abs error << 1e-3
    assert jnp.allclose(out, ref, atol=1e-3, rtol=1e-3), "mismatch vs reference"

    print("KERNEL_OK")
</pallas_src>

<mosaic_0001>
module attributes {stable_mosaic.version = 11 : i64} {
  func.func @_tab_input_kernel(%arg0: i32, %arg1: memref<128x3xi32, #tpu.memory_space<vmem>>, %arg2: memref<128x4xf32, #tpu.memory_space<vmem>>, %arg3: memref<1x4xf32, #tpu.memory_space<vmem>>, %arg4: memref<1x4xf32, #tpu.memory_space<vmem>>, %arg5: memref<22x13xbf16, #tpu.memory_space<vmem>>, %arg6: memref<128x128xf32, #tpu.memory_space<vmem>>) attributes {dimension_semantics = [#tpu.dimension_semantics<parallel>], iteration_bounds = array<i64: 2>, scalar_prefetch = 0 : i64, scratch_operands = 0 : i64, tpu.core_type = #tpu.core_type<tc>, window_params = [{transform_indices = @transform_0, window_bounds = array<i64: 128, 3>}, {transform_indices = @transform_1, window_bounds = array<i64: 128, 4>}, {pipeline_mode = #tpu.pipeline_mode<synchronous>, transform_indices = @transform_2, window_bounds = array<i64: 1, 4>}, {pipeline_mode = #tpu.pipeline_mode<synchronous>, transform_indices = @transform_3, window_bounds = array<i64: 1, 4>}, {pipeline_mode = #tpu.pipeline_mode<synchronous>, transform_indices = @transform_4, window_bounds = array<i64: 22, 13>}, {transform_indices = @transform_5, window_bounds = array<i64: 128, 128>}]} {
    %c0 = arith.constant 0 : index
    %c0_0 = arith.constant 0 : index
    %0 = vector.load %arg1[%c0, %c0_0] : memref<128x3xi32, #tpu.memory_space<vmem>>, vector<128x3xi32>
    %1 = tpu.iota {dimensions = array<i32: 1>} : vector<128x22xi32>
    %2 = vector.extract_strided_slice %0 {offsets = [0, 0], sizes = [128, 1], strides = [1, 1]} : vector<128x3xi32> to vector<128x1xi32>
    %3 = vector.broadcast %2 : vector<128x1xi32> to vector<128x22xi32>
    %4 = arith.cmpi eq, %1, %3 : vector<128x22xi32>
    %5 = vector.extract_strided_slice %0 {offsets = [0, 1], sizes = [128, 1], strides = [1, 1]} : vector<128x3xi32> to vector<128x1xi32>
    %6 = vector.broadcast %5 : vector<128x1xi32> to vector<128x22xi32>
    %7 = arith.cmpi eq, %1, %6 : vector<128x22xi32>
    %8 = arith.ori %4, %7 : vector<128x22xi1>
    %9 = vector.extract_strided_slice %0 {offsets = [0, 2], sizes = [128, 1], strides = [1, 1]} : vector<128x3xi32> to vector<128x1xi32>
    %10 = vector.broadcast %9 : vector<128x1xi32> to vector<128x22xi32>
    %11 = arith.cmpi eq, %1, %10 : vector<128x22xi32>
    %12 = arith.ori %8, %11 : vector<128x22xi1>
    %13 = arith.extui %12 : vector<128x22xi1> to vector<128x22xi32>
    %14 = arith.sitofp %13 : vector<128x22xi32> to vector<128x22xf32>
    %15 = arith.truncf %14 : vector<128x22xf32> to vector<128x22xbf16>
    %c0_1 = arith.constant 0 : index
    %c0_2 = arith.constant 0 : index
    %16 = vector.load %arg5[%c0_1, %c0_2] : memref<22x13xbf16, #tpu.memory_space<vmem>>, vector<22x13xbf16>
    %cst = arith.constant dense<0.000000e+00> : vector<128x13xf32>
    %17 = tpu.matmul %15, %16, %cst {dimension_numbers = #tpu.dot_dimension_numbers<[1], [0], [0], [1], [0, 0, 1, 1], [], []>} : vector<128x22xbf16>, vector<22x13xbf16>, vector<128x13xf32> -> vector<128x13xf32>
    %c0_3 = arith.constant 0 : index
    %c0_4 = arith.constant 0 : index
    %18 = vector.load %arg2[%c0_3, %c0_4] : memref<128x4xf32, #tpu.memory_space<vmem>>, vector<128x4xf32>
    %c0_5 = arith.constant 0 : index
    %c0_6 = arith.constant 0 : index
    %19 = vector.load %arg3[%c0_5, %c0_6] : memref<1x4xf32, #tpu.memory_space<vmem>>, vector<1x4xf32>
    %20 = vector.broadcast %19 : vector<1x4xf32> to vector<128x4xf32>
    %21 = arith.mulf %18, %20 : vector<128x4xf32>
    %c0_7 = arith.constant 0 : index
    %c0_8 = arith.constant 0 : index
    %22 = vector.load %arg4[%c0_7, %c0_8] : memref<1x4xf32, #tpu.memory_space<vmem>>, vector<1x4xf32>
    %23 = vector.broadcast %22 : vector<1x4xf32> to vector<128x4xf32>
    %24 = arith.addf %21, %23 : vector<128x4xf32>
    %cst_9 = arith.constant 0.000000e+00 : f32
    %25 = vector.broadcast %cst_9 : f32 to vector<128x111xf32>
    %26 = tpu.concatenate %17, %24, %25 in 1 : vector<128x13xf32>, vector<128x4xf32>, vector<128x111xf32> -> vector<128x128xf32>
    %c0_10 = arith.constant 0 : index
    %c0_11 = arith.constant 0 : index
    %27 = vector.load %arg6[%c0_10, %c0_11] : memref<128x128xf32, #tpu.memory_space<vmem>>, vector<128x128xf32>
    tpu.vector_store %arg6[%c0_10, %c0_11], %26 {strides = array<i32>} : memref<128x128xf32, #tpu.memory_space<vmem>>, vector<128x128xf32>,
    return
  }
  func.func @transform_0(%arg0: i32) -> (i32, i32) {
    %c0_i32 = arith.constant 0 : i32
    %c0_i32_0 = arith.constant 0 : i32
    return %arg0, %c0_i32 : i32, i32
  }
  func.func @transform_1(%arg0: i32) -> (i32, i32) {
    %c0_i32 = arith.constant 0 : i32
    %c0_i32_0 = arith.constant 0 : i32
    return %arg0, %c0_i32 : i32, i32
  }
  func.func @transform_2(%arg0: i32) -> (i32, i32) {
    %c0_i32 = arith.constant 0 : i32
    %c0_i32_0 = arith.constant 0 : i32
    %c0_i32_1 = arith.constant 0 : i32
    return %c0_i32, %c0_i32_0 : i32, i32
  }
  func.func @transform_3(%arg0: i32) -> (i32, i32) {
    %c0_i32 = arith.constant 0 : i32
    %c0_i32_0 = arith.constant 0 : i32
    %c0_i32_1 = arith.constant 0 : i32
    return %c0_i32, %c0_i32_0 : i32, i32
  }
  func.func @transform_4(%arg0: i32) -> (i32, i32) {
    %c0_i32 = arith.constant 0 : i32
    %c0_i32_0 = arith.constant 0 : i32
    %c0_i32_1 = arith.constant 0 : i32
    return %c0_i32, %c0_i32_0 : i32, i32
  }
  func.func @transform_5(%arg0: i32) -> (i32, i32) {
    %c0_i32 = arith.constant 0 : i32
    %c0_i32_0 = arith.constant 0 : i32
    return %arg0, %c0_i32 : i32, i32
  }
}

</mosaic_0001>

<bundles_post_ra>
// kernel: tpu_custom_call.1
= control target key start
LH: loop header
LB: loop body
LE: loop exit
PB: predicated region body
PF: predicated region fallthrough
CT: control target
= control target key end

     0   :  { %10 = vsyncpa [#allocation3], 0  ;;  %s1579_s0 = inlined_call_operand.vmem [shape: s32[256,3], index: 0, kind: input, shape index: {}]   ;;  %s1580_s1 = inlined_call_operand.vmem [shape: f32[256,4], index: 1, kind: input, shape index: {}]   ;;  %s1581_s2 = inlined_call_operand.vmem [shape: f32[1,4], index: 2, kind: input, shape index: {}]   ;;  %s1582_s3 = inlined_call_operand.vmem [shape: f32[1,4], index: 3, kind: input, shape index: {}]   ;;  %s1583_s4 = inlined_call_operand.vmem [shape: bf16[22,13], index: 4, kind: input, shape index: {}]   ;;  %s1584_s5 = inlined_call_operand.hbm [shape: f32[256,128], index: 5, kind: output, shape index: {}]  }
   0x1   :  { %12 = vsyncpa [#allocation3 + $0x1], 0  ;;  %s1175_s18 = smov 0   ;;  %s1177_s19 = smov 0  }
   0x2   :  { %s1179_s20 = smov 0   ;;  %s1181_s21 = smov 0  }
   0x3 LB: > { %s1196_s22 = sadd.s32 4294967295, %s1135_s21   ;;  %s933_s23 = sadd.s32 4294967294, %s1135_s21   ;;  %s1135_s21 = sphi %s1181_s21, %s1595_s21   ;;  %s1131_s20 = sphi %s1179_s20, %s1594_s20   ;;  %s1127_s19 = sphi %s1177_s19, %s1593_s19   ;;  %s1123_s18 = sphi %s1175_s18, %s1592_s18  }
   0x4   : > { %s1200_s24 = sadd.s32 1, %s1135_s21   ;;  %s140_s25 = sadd.s32 1, %s1131_s20 }
   0x5   : > { %s137_s26 = ssub.s32 %s1135_s21, %s1200_s24  ;;  %p150_p0 = scmp.ne.s32.totalorder %s1131_s20, %s1127_s19 }
   0x6   : > { %p138_p1 = scmp.eq.s32.totalorder %s137_s26, 0  ;;  %p151_p2 = scmp.eq.s32.totalorder %s1196_s22, 1 }
   0x7   : > { %p156_p3 = scmp.ne.s32.totalorder %s1127_s19, %s1123_s18  ;;  %p157_p4 = scmp.eq.s32.totalorder %s933_s23, 1 }
   0x8   : > { %s1211_s27 = scalar_select %p138_p1, %s1131_s20, %s140_s25  }
   0x9   : > { %p1213_p5 = por %p151_p2, %p150_p0  ;;  %p1217_p6 = por %p157_p4, %p156_p3 }
   0xa   : > { %p936_p7 = scmp.ge.s32.totalorder %s1135_s21, 1  ;;  %p202_p8 = scmp.lt.s32.totalorder %s1135_s21, 3 }
   0xc   : > { %p203_p9 = pnand %p936_p7, %p202_p8 }
   0xd   : > { %s938_s30 = sshll.u32 (!%p203_p9), %s1196_s22, 4  ;;  %v1137_v0 = vmov (!%p203_p9), 0   ;;  %v1138_v6 = vmov (!%p203_p9), 1   ;;  %v1139_v14 = vmov (!%p203_p9), 2   ;;  %v1071_v17 = vld [vmem:[%s1583_s4] sm:$0xff] (!%p203_p9)   ;;  %vm568_vm0 = vcmask (!%p203_p9), 1042432  }
   0xe   : > { %206 = sbr.rel (%p203_p9) target bundleno = 507 (0x1fb), region = 40  ;;  %1059 = vset.pattern.permute.xlu1 (!%p203_p9), %v1137_v0  ;;  %1058 = vset.pattern.permute.xlu0 (!%p203_p9), %v1137_v0  ;;  %p236_p10 = scmp.lt.s32.totalorder (!%p203_p9), %s938_s30, 31  ;;  %v1072_v18 = vld [vmem:[%s1583_s4 + $0x8] ss:$0 sps:$4 sm:$0x77] (!%p203_p9)   ;;  %vm1585_vm15 = vcmask (!%p203_p9), 179200  }
   0xf   : > { %986 = vmatprep.subr.bf16.mxu0 (!%p203_p9), %v1071_v17  ;;  %1006 = vmatprep.subr.bf16.mxu1 (!%p203_p9), %v1071_v17  ;;  %v570_v19 = vsel (!%p203_p9), %vm568_vm0, %v1072_v18, 0  ;;  %v1282_v23 = vld [vmem:[%s1581_s2] ss:$0 sm:$0xff] (!%p203_p9)  ;;  %s1142_s15 = smov (!%p203_p9), [#allocation2]  }
  0x10   : > { %987 = vmatpush3.bf16.msra.mxu0 (!%p203_p9), %v1071_v17  ;;  %1008 = vmatpush3.bf16.msra.mxu1 (!%p203_p9), %v1071_v17  ;;  %v1287_v24 = vld [vmem:[%s1582_s3] ss:$0 sm:$0xff] (!%p203_p9) }
  0x11   : > { %1010 = vmatprep.subr.msk.bf16.mxu0 (!%p203_p9), %vm568_vm0, %v1072_v18  ;;  %1011 = vmatprep.subr.msk.bf16.mxu1 (!%p203_p9), %vm568_vm0, %v1072_v18 }
  0x14   : > { %989 = vmatpush3.bf16.msra.mxu0 (!%p203_p9), %v570_v19  ;;  %1009 = vmatpush3.bf16.msra.mxu1 (!%p203_p9), %v570_v19 }
  0x15   : > { %s1597_s30 = smov (!%p236_p10, %s938_s30), 31 }
  0x16   : > { %s939_s6 = sshll.u32 %s1597_s30, 3  ;;  %s1140_s30 = smov 13  }
  0x17   : > { %s1234_s9 = scalar_lea.vmem %s1579_s0, %s939_s6  ;;  %s1276_s16 = scalar_lea.vmem %s1580_s1, %s939_s6 }
  0x18   : > { %v257_v1 = vld [vmem:[%s1234_s9 + $0x40] sm:$0xff]  ;;  %v258_v3 = vld [vmem:[%s1234_s9 + $0x48] sm:$0xff]  ;;  %v252_v5 = vld [vmem:[%s1234_s9 + $0x18] sm:$0xff]  ;;  %s232_s6 = sand.u32 1, %s1127_s19  }
  0x19   : > { %v249_v2 = vld [vmem:[%s1234_s9] sm:$0xff]  ;;  %292 = vperm.xlu1 %1059, %v257_v1   ;;  %v250_v4 = vld [vmem:[%s1234_s9 + $0x8] sm:$0xff]  ;;  %v251_v9 = vld [vmem:[%s1234_s9 + $0x10] sm:$0xff]  ;;  %s937_s7 = sshll.u32 %s232_s6, 7  ;;  %s1538_s13 = scalar_lea.sflag [#allocation3], %s232_s6 }
  0x1a   : > { %268 = vperm.xlu0 %1058, %v249_v2   ;;  %v253_v7 = vld [vmem:[%s1234_s9 + $0x20] sm:$0xff]  ;;  %v262_v8 = vld [vmem:[%s1234_s9 + $0x68] sm:$0xff]  ;;  %v1247_v10 = vld [vmem:[%s1234_s9 + $0x30] sm:$0xff]  ;;  %s1480_s8 = scalar_lea.vmem [#allocation2], %s937_s7 }
  0x1b   : > { %v259_v11 = vld [vmem:[%s1234_s9 + $0x50] sm:$0xff]  ;;  %v264_v12 = vld [vmem:[%s1234_s9 + $0x78] sm:$0xff]  ;;  %v254_v15 = vld [vmem:[%s1234_s9 + $0x28] sm:$0xff]  ;;  %s859_s10 = sshll.u32 %s1480_s8, 4  ;;  %s1528_s10 = int_to_ptr.vmem [resolvable:$true] %s859_s10 }
  0x1c   : > { %v260_v13 = vld [vmem:[%s1234_s9 + $0x58] sm:$0xff]  ;;  %v261_v20 = vld [vmem:[%s1234_s9 + $0x60] sm:$0xff]  ;;  %v263_v21 = vld [vmem:[%s1234_s9 + $0x70] sm:$0xff]  ;;  %s1073_s14 = scalar_lea.vmem %s1528_s10, 2048 }
  0x1d   : > { %295 = vperm.xlu1 %1059, %v258_v3   ;;  %v256_v16 = vld [vmem:[%s1234_s9 + $0x38] sm:$0xff]  ;;  %v669_v22 = vld [vmem:[%s1276_s16] sm:$0xff]  ;;  %v670_v26 = vld [vmem:[%s1276_s16 + $0x8] sm:$0xff]  ;;  %s975_s9 = sshll.u32 %s1196_s22, 11  ;;  %p1074_p11 = scmp.ne.s32.totalorder %s1528_s10, %s1073_s14 }
  0x1e   : > { %271 = vperm.xlu0 %1058, %v250_v4   ;;  %v692_v25 = vmul.f32 %v1282_v23, %v669_v22  ;;  %v671_v27 = vld [vmem:[%s1276_s16 + $0x10] sm:$0xff]  ;;  %v672_v28 = vld [vmem:[%s1276_s16 + $0x18] sm:$0xff]  ;;  %v693_v29 = vmul.f32 %v1282_v23, %v670_v26  ;;  %v673_v32 = vld [vmem:[%s1276_s16 + $0x20] sm:$0xff]  ;;  %s1526_s12 = scalar_lea.hbm %s1584_s5, %s975_s9 }
  0x1f   : > { %v694_v30 = vmul.f32 %v1282_v23, %v671_v27  ;;  %v695_v31 = vmul.f32 %v1282_v23, %v672_v28  ;;  %v674_v34 = vld [vmem:[%s1276_s16 + $0x28] sm:$0xff]  ;;  %v696_v39 = vmul.f32 %v1282_v23, %v673_v32  ;;  %v675_v42 = vld [vmem:[%s1276_s16 + $0x30] sm:$0xff]  ;;  %v676_v43 = vld [vmem:[%s1276_s16 + $0x38] sm:$0xff]  ;;  %v265_v28 = vlaneseq  ;;  %p1075_p12 = pnand %p1074_p11, %p1213_p5 }
  0x20   : > { %v715_v33 = vadd.f32 %v1287_v24, %v692_v25  ;;  %v716_v35 = vadd.f32 %v1287_v24, %v693_v29  ;;  %v697_v41 = vmul.f32 %v1282_v23, %v674_v34  ;;  %v698_v47 = vmul.f32 %v1282_v23, %v675_v42  ;;  %v677_v50 = vld [vmem:[%s1276_s16 + $0x40] sm:$0xff]  ;;  %v678_v51 = vld [vmem:[%s1276_s16 + $0x48] sm:$0xff]  ;;  %v679_v58 = vld [vmem:[%s1276_s16 + $0x50] sm:$0xff] }
  0x21   : > { %1060 = vset.pattern.permute.xlu1 %v1138_v6  ;;  %v717_v38 = vadd.f32 %v1287_v24, %v694_v30  ;;  %v718_v40 = vadd.f32 %v1287_v24, %v695_v31  ;;  %v719_v46 = vadd.f32 %v1287_v24, %v696_v39  ;;  %v699_v49 = vmul.f32 %v1282_v23, %v676_v43  ;;  %v680_v59 = vld [vmem:[%s1276_s16 + $0x58] sm:$0xff]  ;;  %p1076_p13 = pneg %p1075_p12 }
  0x22   : > { %277 = vperm.xlu0 %1058, %v252_v5   ;;  %335 = vperm.xlu1 %1060, %v250_v4   ;;  %v720_v48 = vadd.f32 %v1287_v24, %v697_v41  ;;  %v721_v53 = vadd.f32 %v1287_v24, %v698_v47  ;;  %v700_v54 = vmul.f32 %v1282_v23, %v677_v50  ;;  %v1380_v31 = vand.u32 127, %v265_v28 }
  0x23   : > { %v722_v56 = vadd.f32 %v1287_v24, %v699_v49  ;;  %v701_v57 = vmul.f32 %v1282_v23, %v678_v51  ;;  %v702_v62 = vmul.f32 %v1282_v23, %v679_v58 }
  0x24   : > { %v723_v61 = vadd.f32 %v1287_v24, %v700_v54 }
  0x26   : > { %280 = vperm.xlu0 %1058, %v253_v7   ;;  %356 = vperm.xlu1 %1060, %v257_v1  }
  0x2a   : > { %307 = vperm.xlu0 %1058, %v262_v8   ;;  %1061 = vset.pattern.permute.xlu1 %v1137_v0 }
  0x2b   : > { %274 = vperm.xlu1 %1061, %v251_v9  }
  0x2e   : > { %286 = vperm.xlu0 %1058, %v1247_v10  }
  0x2f   : > { %298 = vperm.xlu1 %1061, %v259_v11  }
  0x32   : > { %313 = vperm.xlu0 %1058, %v264_v12  }
  0x33   : > { %301 = vperm.xlu1 %1061, %v260_v13  }
  0x36   : > { %1067 = vset.pattern.permute.xlu0 %v1138_v6 }
  0x37   : > { %332 = vperm.xlu0 %1067, %v249_v2   ;;  %1062 = vset.pattern.permute.xlu1 %v1138_v6 }
  0x38   : > { %341 = vperm.xlu1 %1062, %v252_v5  }
  0x3b   : > { %359 = vperm.xlu0 %1067, %v258_v3  }
  0x3c   : > { %362 = vperm.xlu1 %1062, %v259_v11  }
  0x3f   : > { %338 = vperm.xlu0 %1067, %v251_v9  }
  0x40   : > { %1063 = vset.pattern.permute.xlu1 %v1139_v14 }
  0x41   : > { %412 = vperm.xlu1 %1063, %v249_v2   ;;  %v681_v2 = vld [vmem:[%s1276_s16 + $0x60] sm:$0xff] }
  0x43   : > { %365 = vperm.xlu0 %1067, %v260_v13  }
  0x45   : > { %436 = vperm.xlu1 %1063, %v257_v1   ;;  %v703_v1 = vmul.f32 %v1282_v23, %v680_v59 }
  0x47   : > { %347 = vperm.xlu0 %1067, %v254_v15  }
  0x49   : > { %439 = vperm.xlu1 %1063, %v258_v3   ;;  %v682_v3 = vld [vmem:[%s1276_s16 + $0x68] sm:$0xff] }
  0x4b   : > { %353 = vperm.xlu0 %1067, %v256_v16  }
  0x4d   : > { %421 = vperm.xlu1 %1063, %v252_v5   ;;  %v725_v5 = vadd.f32 %v1287_v24, %v702_v62 }
  0x4f   : > { %1069 = vset.pattern.permute.xlu0 %v1139_v14 }
  0x50   : > { %415 = vperm.xlu0 %1069, %v250_v4  }
  0x51   : > { %445 = vperm.xlu1 %1063, %v260_v13  }
  0x54   : > { %418 = vperm.xlu0 %1069, %v251_v9   ;;  %v683_v9 = vld [vmem:[%s1276_s16 + $0x70] sm:$0xff] }
  0x55   : > { %1064 = vset.pattern.permute.xlu1 %v1137_v0 }
  0x56   : > { %283 = vperm.xlu1 %1064, %v254_v15  }
  0x58   : > { %442 = vperm.xlu0 %1069, %v259_v11   ;;  %v684_v11 = vld [vmem:[%s1276_s16 + $0x78] sm:$0xff]  ;;  %s1077_s16 = sshll.u32 %s1142_s15, 4  ;;  %s1078_s16 = int_to_ptr.vmem [resolvable:$false] %s1077_s16 }
  0x59   : > { %s1079_s17 = scalar_lea.vmem %s1078_s16, 4096  ;;  %p1080_p0 = scmp.lt.s32.totalorder %s1528_s10, %s1078_s16 }
  0x5a   : > { %304 = vperm.xlu1 %1064, %v261_v20   ;;  %p1081_p1 = scmp.lt.s32.totalorder %s1079_s17, %s1073_s14 }
  0x5c   : > { %424 = vperm.xlu0 %1069, %v253_v7   ;;  %p1082_p2 = por %p1081_p1, %p1080_p0 }
  0x5e   : > { %1065 = vset.pattern.permute.xlu1 %v1138_v6  ;;  %p1083_p3 = pnand %p1082_p2, %p1076_p13 }
  0x5f   : > { %344 = vperm.xlu1 %1065, %v253_v7   ;;  %v726_v7 = vadd.f32 %v1287_v24, %v703_v1 }
  0x60   : > { %451 = vperm.xlu0 %1069, %v262_v8  }
  0x63   : > { %368 = vperm.xlu1 %1065, %v261_v20  }
  0x64   : > { %433 = vperm.xlu0 %1069, %v256_v16  }
  0x67   : > { %371 = vperm.xlu1 %1065, %v262_v8   ;;  %v705_v8 = vmul.f32 %v1282_v23, %v682_v3 }
  0x68   : > { %457 = vperm.xlu0 %1069, %v264_v12  }
  0x6b   : > { %1066 = vset.pattern.permute.xlu1 %v1137_v0  ;;  %v724_v0 = vadd.f32 %v1287_v24, %v701_v57 }
  0x6c   : > { %289 = vperm.xlu1 %1066, %v256_v16   ;;  %749 = vrot.lane.b32.xlu0 %v716_v35, %s1140_s30  ;;  %v707_v16 = vmul.f32 %v1282_v23, %v684_v11  ;;  %v1141_v35 = vmov 0.0  }
  0x70   : > { %310 = vperm.xlu1 %1066, %v263_v21   ;;  %753 = vrot.lane.b32.xlu0 %v718_v40, %s1140_s30 }
  0x74   : > { %1068 = vset.pattern.permute.xlu1 %v1138_v6  ;;  %757 = vrot.lane.b32.xlu0 %v720_v48, %s1140_s30  ;;  %v704_v6 = vmul.f32 %v1282_v23, %v681_v2 }
  0x75   : > { %350 = vperm.xlu1 %1068, %v1247_v10  }
  0x76   : > { %v727_v13 = vadd.f32 %v1287_v24, %v704_v6 }
  0x78   : > { %761 = vrot.lane.b32.xlu0 %v722_v56, %s1140_s30 }
  0x79   : > { %374 = vperm.xlu1 %1068, %v263_v21  }
  0x7c   : > { %765 = vrot.lane.b32.xlu0 %v724_v0, %s1140_s30 }
  0x7d   : > { %377 = vperm.xlu1 %1068, %v264_v12  }
  0x80   : > { %769 = vrot.lane.b32.xlu0 %v726_v7, %s1140_s30 }
  0x81   : > { %1070 = vset.pattern.permute.xlu1 %v1139_v14  ;;  %v706_v14 = vmul.f32 %v1282_v23, %v683_v9 }
  0x82   : > { %427 = vperm.xlu1 %1070, %v254_v15   ;;  %v728_v15 = vadd.f32 %v1287_v24, %v705_v8 }
  0x83   : > { %v729_v19 = vadd.f32 %v1287_v24, %v706_v14 }
  0x84   : > { %773 = vrot.lane.b32.xlu0 %v728_v15, %s1140_s30 }
  0x86   : > { %448 = vperm.xlu1 %1070, %v261_v20   ;;  %v730_v20 = vadd.f32 %v1287_v24, %v707_v16 }
  0x88   : > { %777 = vrot.lane.b32.xlu0 %v730_v20, %s1140_s30 }
  0x8a   : > { %430 = vperm.xlu1 %1070, %v1247_v10  }
  0x8e   : > { %454 = vperm.xlu1 %1070, %v263_v21  }
  0x92   : > { %747 = vrot.lane.b32.xlu1 %v715_v33, %s1140_s30 }
  0x96   : > { %751 = vrot.lane.b32.xlu1 %v717_v38, %s1140_s30 }
  0x98   : > { %v1300_v36 = vpop.permute.xlu1 %292 }
  0x99   : > { %v1302_v37 = vpop.permute.xlu0 %268  ;;  %vm323_vm3 = vcmp.eq.s32.totalorder %v1380_v31, %v1300_v36 }
  0x9a   : > { %755 = vrot.lane.b32.xlu1 %v719_v46, %s1140_s30  ;;  %vm315_vm6 = vcmp.eq.s32.totalorder %v1380_v31, %v1302_v37 }
  0x9c   : > { %v1312_v44 = vpop.permute.xlu1 %295 }
  0x9d   : > { %v1314_v45 = vpop.permute.xlu0 %271  ;;  %vm324_vm7 = vcmp.eq.s32.totalorder %v1380_v31, %v1312_v44 }
  0x9e   : > { %759 = vrot.lane.b32.xlu1 %v721_v53, %s1140_s30  ;;  %vm316_vm0 = vcmp.eq.s32.totalorder %v1380_v31, %v1314_v45 }
  0xa1   : > { %v1324_v52 = vpop.permute.xlu0 %277  ;;  %v1329_v55 = vpop.permute.xlu1 %335 }
  0xa2   : > { %763 = vrot.lane.b32.xlu1 %v723_v61, %s1140_s30 }
  0xa5   : > { %v1336_v60 = vpop.permute.xlu0 %280  ;;  %v357_v63 = vpop.permute.xlu1 %356 }
  0xa6   : > { %767 = vrot.lane.b32.xlu1 %v725_v5, %s1140_s30  ;;  %vm387_vm1 = vcmp.eq.s32.totalorder %v1380_v31, %v357_v63 }
  0xa7   : > { %vm403_vm5 = vmor %vm323_vm3, %vm387_vm1  ;;  %vm380_vm1 = vcmp.eq.s32.totalorder %v1380_v31, %v1329_v55 }
  0xa9   : > { %v1346_v4 = vpop.permute.xlu0 %307 }
  0xaa   : > { %v1355_v10 = vpop.permute.xlu1 %274  ;;  %771 = vrot.lane.b32.xlu1 %v727_v13, %s1140_s30 }
  0xad   : > { %v1358_v12 = vpop.permute.xlu0 %286 }
  0xae   : > { %v1366_v17 = vpop.permute.xlu1 %298  ;;  %775 = vrot.lane.b32.xlu1 %v729_v19, %s1140_s30 }
  0xb1   : > { %v1368_v18 = vpop.permute.xlu0 %313 }
  0xb2   : > { %v1374_v21 = vpop.permute.xlu1 %301 }
  0xb6   : > { %v333_v22 = vpop.permute.xlu0 %332 }
  0xb7   : > { %v342_v23 = vpop.permute.xlu1 %341  ;;  %vm379_vm8 = vcmp.eq.s32.totalorder %v1380_v31, %v333_v22 }
  0xb8   : > { %vm395_vm13 = vmor %vm315_vm6, %vm379_vm8  ;;  %vm382_vm3 = vcmp.eq.s32.totalorder %v1380_v31, %v342_v23 }
  0xba   : > { %v360_v25 = vpop.permute.xlu0 %359 }
  0xbb   : > { %v1378_v26 = vpop.permute.xlu1 %362  ;;  %vm388_vm4 = vcmp.eq.s32.totalorder %v1380_v31, %v360_v25 }
  0xbc   : > { %vm404_vm10 = vmor %vm324_vm7, %vm388_vm4 }
  0xbe   : > { %v339_v27 = vpop.permute.xlu0 %338 }
  0xbf   : > { %vm381_vm8 = vcmp.eq.s32.totalorder %v1380_v31, %v339_v27 }
  0xc0   : > { %v413_v29 = vpop.permute.xlu1 %412 }
  0xc1   : > { %vm459_vm14 = vcmp.eq.s32.totalorder %v1380_v31, %v413_v29 }
  0xc2   : > { %v366_v30 = vpop.permute.xlu0 %365  ;;  %vm475_vm4 = vmor %vm395_vm13, %vm459_vm14 }
  0xc3   : > { %v942_v42 = vsel %vm475_vm4, 1.0, %v1141_v35 }
  0xc4   : > { %v437_v24 = vpop.permute.xlu1 %436 }
  0xc5   : > { %vm467_vm2 = vcmp.eq.s32.totalorder %v1380_v31, %v437_v24 }
  0xc6   : > { %v1384_v32 = vpop.permute.xlu0 %347  ;;  %vm483_vm9 = vmor %vm403_vm5, %vm467_vm2  ;;  %vm318_vm2 = vcmp.eq.s32.totalorder %v1380_v31, %v1324_v52 }
  0xc7   : > { %v950_v36 = vsel %vm483_vm9, 1.0, %v1141_v35  ;;  %vm396_vm5 = vmor %vm316_vm0, %vm380_vm1 }
  0xc8   : > { %v440_v33 = vpop.permute.xlu1 %439 }
  0xc9   : > { %vm468_vm11 = vcmp.eq.s32.totalorder %v1380_v31, %v440_v33 }
  0xca   : > { %v1395_v34 = vpop.permute.xlu0 %353  ;;  %vm484_vm12 = vmor %vm404_vm10, %vm468_vm11  ;;  %vm317_vm11 = vcmp.eq.s32.totalorder %v1380_v31, %v1355_v10 }
  0xcb   : > { %v951_v37 = vsel %vm484_vm12, 1.0, %v1141_v35  ;;  %vm398_vm10 = vmor %vm318_vm2, %vm382_vm3  ;;  %vm390_vm12 = vcmp.eq.s32.totalorder %v1380_v31, %v366_v30  ;;  %vm326_vm2 = vcmp.eq.s32.totalorder %v1380_v31, %v1374_v21  ;;  %vm389_vm3 = vcmp.eq.s32.totalorder %v1380_v31, %v1378_v26 }
  0xcc   : > { %v422_v38 = vpop.permute.xlu1 %421  ;;  %v527_v39 = vpack.c.bf16 %v951_v37, %v950_v36  ;;  %vm397_vm14 = vmor %vm317_vm11, %vm381_vm8 }
  0xcd   : > { %vm462_vm6 = vcmp.eq.s32.totalorder %v1380_v31, %v422_v38 }
  0xce   : > { %998 = vmatprep.mubr.msk.bf16.mxu1 %vm1585_vm15, %v527_v39  ;;  %vm478_vm13 = vmor %vm398_vm10, %vm462_vm6  ;;  %vm325_vm6 = vcmp.eq.s32.totalorder %v1380_v31, %v1366_v17 }
  0xcf   : > { %v416_v40 = vpop.permute.xlu0 %415  ;;  %v945_v46 = vsel %vm478_vm13, 1.0, %v1141_v35  ;;  %vm405_vm8 = vmor %vm325_vm6, %vm389_vm3  ;;  %vm328_vm3 = vcmp.eq.s32.totalorder %v1380_v31, %v1346_v4 }
  0xd0   : > { %vm460_vm7 = vcmp.eq.s32.totalorder %v1380_v31, %v416_v40  ;;  %v446_v41 = vpop.permute.xlu1 %445 }
  0xd1   : > { %vm476_vm9 = vmor %vm396_vm5, %vm460_vm7  ;;  %vm470_vm0 = vcmp.eq.s32.totalorder %v1380_v31, %v446_v41 }
  0xd2   : > { %v943_v43 = vsel %vm476_vm9, 1.0, %v1141_v35  ;;  %vm406_vm5 = vmor %vm326_vm2, %vm390_vm12  ;;  %vm319_vm12 = vcmp.eq.s32.totalorder %v1380_v31, %v1336_v60 }
  0xd3   : > { %v419_v44 = vpop.permute.xlu0 %418  ;;  %v523_v45 = vpack.c.bf16 %v943_v43, %v942_v42  ;;  %vm486_vm7 = vmor %vm406_vm5, %vm470_vm0 }
  0xd4   : > { %vm461_vm1 = vcmp.eq.s32.totalorder %v1380_v31, %v419_v44  ;;  %v953_v51 = vsel %vm486_vm7, 1.0, %v1141_v35 }
  0xd5   : > { %vm477_vm4 = vmor %vm397_vm14, %vm461_vm1  ;;  %990 = vmatprep.mubr.msk.bf16.mxu0 %vm1585_vm15, %v523_v45  ;;  %v284_v48 = vpop.permute.xlu1 %283  ;;  %vm384_vm1 = vcmp.eq.s32.totalorder %v1380_v31, %v1384_v32 }
  0xd6   : > { %v944_v47 = vsel %vm477_vm4, 1.0, %v1141_v35  ;;  %vm320_vm2 = vcmp.eq.s32.totalorder %v1380_v31, %v284_v48 }
  0xd7   : > { %v524_v49 = vpack.c.bf16 %v945_v46, %v944_v47  ;;  %v443_v50 = vpop.permute.xlu0 %442  ;;  %vm400_vm7 = vmor %vm320_vm2, %vm384_vm1 }
  0xd8   : > { %vm469_vm9 = vcmp.eq.s32.totalorder %v1380_v31, %v443_v50 }
  0xd9   : > { %vm485_vm10 = vmor %vm405_vm8, %vm469_vm9  ;;  %991 = vmatmul.mubr.msk.bf16.vlgmr.msra.gmra.mrb[0].mxu0 %vm1585_vm15, %v524_v49  ;;  %v305_v53 = vpop.permute.xlu1 %304 }
  0xda   : > { %v952_v52 = vsel %vm485_vm10, 1.0, %v1141_v35 }
  0xdb   : > { %v528_v54 = vpack.c.bf16 %v953_v51, %v952_v52  ;;  %v425_v62 = vpop.permute.xlu0 %424 }
  0xdc   : > { %vm463_vm14 = vcmp.eq.s32.totalorder %v1380_v31, %v425_v62 }
  0xdd   : > { %999 = vmatmul.mubr.msk.bf16.vlgmr.msra.gmra.mrb[0].mxu1 %vm1585_vm15, %v528_v54 }
  0xde   : > { %v345_v55 = vpop.permute.xlu1 %344 }
  0xdf   : > { %vm383_vm11 = vcmp.eq.s32.totalorder %v1380_v31, %v345_v55  ;;  %v452_v0 = vpop.permute.xlu0 %451 }
  0xe0   : > { %vm399_vm13 = vmor %vm319_vm12, %vm383_vm11  ;;  %vm472_vm6 = vcmp.eq.s32.totalorder %v1380_v31, %v452_v0  ;;  %vm386_vm12 = vcmp.eq.s32.totalorder %v1380_v31, %v1395_v34 }
  0xe1   : > { %vm479_vm4 = vmor %vm399_vm13, %vm463_vm14  ;;  %vm327_vm13 = vcmp.eq.s32.totalorder %v1380_v31, %v305_v53 }
  0xe2   : > { %v369_v56 = vpop.permute.xlu1 %368  ;;  %v946_v3 = vsel %vm479_vm4, 1.0, %v1141_v35  ;;  %vm1588_vm4 = vcmask 179200  }
  0xe3   : > { %v434_v2 = vpop.permute.xlu0 %433  ;;  %vm391_vm10 = vcmp.eq.s32.totalorder %v1380_v31, %v369_v56 }
  0xe4   : > { %vm407_vm1 = vmor %vm327_vm13, %vm391_vm10 }
  0xe6   : > { %v372_v57 = vpop.permute.xlu1 %371 }
  0xe7   : > { %vm392_vm0 = vcmp.eq.s32.totalorder %v1380_v31, %v372_v57  ;;  %v458_v9 = vpop.permute.xlu0 %457 }
  0xe8   : > { %vm408_vm5 = vmor %vm328_vm3, %vm392_vm0  ;;  %vm466_vm0 = vcmp.eq.s32.totalorder %v1380_v31, %v434_v2 }
  0xe9   : > { %vm488_vm15 = vmor %vm408_vm5, %vm472_vm6  ;;  %vm321_vm5 = vcmp.eq.s32.totalorder %v1380_v31, %v1358_v12 }
  0xea   : > { %v955_v7 = vsel %vm488_vm15, 1.0, %v1141_v35  ;;  %vm474_vm15 = vcmp.eq.s32.totalorder %v1380_v31, %v458_v9 }
  0xeb   : > { %v290_v58 = vpop.permute.xlu1 %289  ;;  %v750_v20 = vpop.permute.xlu0 %749 }
  0xec   : > { %vm322_vm8 = vcmp.eq.s32.totalorder %v1380_v31, %v290_v58 }
  0xed   : > { %vm402_vm14 = vmor %vm322_vm8, %vm386_vm12  ;;  %vm330_vm8 = vcmp.eq.s32.totalorder %v1380_v31, %v1368_v18 }
  0xee   : > { %vm482_vm6 = vmor %vm402_vm14, %vm466_vm0 }
  0xef   : > { %v311_v59 = vpop.permute.xlu1 %310  ;;  %v949_v12 = vsel %vm482_vm6, 1.0, %v1141_v35  ;;  %v754_v22 = vpop.permute.xlu0 %753  ;;  %vm795_vm6 = vcmask 105472  }
  0xf0   : > { %vm329_vm14 = vcmp.eq.s32.totalorder %v1380_v31, %v311_v59 }
  0xf3   : > { %v758_v25 = vpop.permute.xlu0 %757 }
  0xf4   : > { %v351_v61 = vpop.permute.xlu1 %350 }
  0xf5   : > { %vm385_vm2 = vcmp.eq.s32.totalorder %v1380_v31, %v351_v61 }
  0xf6   : > { %vm401_vm10 = vmor %vm321_vm5, %vm385_vm2 }
  0xf7   : > { %v762_v27 = vpop.permute.xlu0 %761 }
  0xf8   : > { %v375_v63 = vpop.permute.xlu1 %374 }
  0xf9   : > { %vm393_vm13 = vcmp.eq.s32.totalorder %v1380_v31, %v375_v63 }
  0xfa   : > { %vm409_vm2 = vmor %vm329_vm14, %vm393_vm13 }
  0xfb   : > { %v766_v29 = vpop.permute.xlu0 %765 }
  0xfc   : > { %v378_v1 = vpop.permute.xlu1 %377 }
  0xff   : > { %v770_v42 = vpop.permute.xlu0 %769 }
 0x101   : > { %v428_v60 = vpop.permute.xlu1 %427 }
 0x102   : > { %vm464_vm9 = vcmp.eq.s32.totalorder %v1380_v31, %v428_v60 }
 0x103   : > { %vm480_vm11 = vmor %vm400_vm7, %vm464_vm9  ;;  %vm394_vm7 = vcmp.eq.s32.totalorder %v1380_v31, %v378_v1  ;;  %v774_v56 = vpop.permute.xlu0 %773 }
 0x104   : > { %v947_v4 = vsel %vm480_vm11, 1.0, %v1141_v35  ;;  %vm410_vm11 = vmor %vm330_vm8, %vm394_vm7  ;;  %vm812_vm8 = vcmask 138240  }
 0x105   : > { %v525_v5 = vpack.c.bf16 %v947_v4, %v946_v3  ;;  %v449_v6 = vpop.permute.xlu1 %448  ;;  %vm490_vm0 = vmor %vm410_vm11, %vm474_vm15 }
 0x106   : > { %vm471_vm3 = vcmp.eq.s32.totalorder %v1380_v31, %v449_v6  ;;  %v957_v16 = vsel %vm490_vm0, 1.0, %v1141_v35 }
 0x107   : > { %vm487_vm9 = vmor %vm407_vm1, %vm471_vm3  ;;  %994 = vmatprep.mubr.msk.bf16.mxu0 %vm1588_vm4, %v525_v5  ;;  %v778_v6 = vpop.permute.xlu0 %777 }
 0x108   : > { %v954_v8 = vsel %vm487_vm9, 1.0, %v1141_v35  ;;  %vm1589_vm3 = vmmov %vm1588_vm4 }
 0x109   : > { %v529_v10 = vpack.c.bf16 %v955_v7, %v954_v8  ;;  %v431_v11 = vpop.permute.xlu1 %430  ;;  %vm1590_vm4 = vmmov %vm1589_vm3 }
 0x10a   : > { %vm465_vm12 = vcmp.eq.s32.totalorder %v1380_v31, %v431_v11  ;;  %vm1591_vm5 = vmmov %vm1589_vm3 }
 0x10b   : > { %vm481_vm1 = vmor %vm401_vm10, %vm465_vm12  ;;  %1002 = vmatprep.mubr.msk.bf16.mxu1 %vm1589_vm3, %v529_v10 }
 0x10c   : > { %v948_v13 = vsel %vm481_vm1, 1.0, %v1141_v35 }
 0x10d   : > { %v526_v14 = vpack.c.bf16 %v949_v12, %v948_v13  ;;  %v455_v15 = vpop.permute.xlu1 %454 }
 0x10e   : > { %vm473_vm7 = vcmp.eq.s32.totalorder %v1380_v31, %v455_v15 }
 0x10f   : > { %vm489_vm9 = vmor %vm409_vm2, %vm473_vm7  ;;  %995 = vmatmul.mubr.msk.bf16.gmra.mrb[4].mxu0 %vm1590_vm4, %v526_v14 }
 0x110   : > { %v956_v17 = vsel %vm489_vm9, 1.0, %v1141_v35 }
 0x111   : > { %v530_v18 = vpack.c.bf16 %v957_v16, %v956_v17  ;;  %v748_v19 = vpop.permute.xlu1 %747 }
 0x113   : > { %1003 = vmatmul.mubr.msk.bf16.gmra.mrb[4].mxu1 %vm1591_vm5, %v530_v18 }
 0x115   : > { %v752_v21 = vpop.permute.xlu1 %751 }
 0x119   : > { %v756_v23 = vpop.permute.xlu1 %755 }
 0x11d   : > { %v760_v26 = vpop.permute.xlu1 %759 }
 0x121   : > { %v764_v28 = vpop.permute.xlu1 %763 }
 0x125   : > { %v768_v35 = vpop.permute.xlu1 %767 }
 0x129   : > { %v772_v55 = vpop.permute.xlu1 %771 }
 0x12d   : > { %v776_v0 = vpop.permute.xlu1 %775 }
 0x1ac   : > { %v992_v30 = vpop.f32.mrb[0].mxu0 }
 0x1ad   : > { %v798_v31 = vsel %vm795_vm6, %v992_v30, %v752_v21  ;;  %v606_v24 = vpop.f32.mrb[1].mxu0 }
 0x1ae   : > { %v815_v32 = vsel %vm812_vm8, %v798_v31, 0.0  ;;  %v796_v33 = vsel %vm795_vm6, %v606_v24, %v748_v19  ;;  %v993_v34 = vpop.f32.mrb[2].mxu0 }
 0x1af   : > { %831 = vst [vmem:[%s1480_s8 + $0x10] sm:$0xff] %v815_v32  ;;  %v813_v36 = vsel %vm812_vm8, %v796_v33, 0.0  ;;  %v799_v37 = vsel %vm795_vm6, %v993_v34, %v754_v22  ;;  %v609_v38 = vpop.f32.mrb[3].mxu0 }
 0x1b0   : > { %829 = vst [vmem:[%s1480_s8] sm:$0xff] %v813_v36  ;;  %v816_v39 = vsel %vm812_vm8, %v799_v37, 0.0  ;;  %v797_v40 = vsel %vm795_vm6, %v609_v38, %v750_v20  ;;  %v1000_v41 = vpop.f32.mrb[0].mxu1 }
 0x1b1   : > { %832 = vst [vmem:[%s1480_s8 + $0x18] sm:$0xff] %v816_v39  ;;  %v814_v43 = vsel %vm812_vm8, %v797_v40, 0.0  ;;  %v806_v44 = vsel %vm795_vm6, %v1000_v41, %v768_v35  ;;  %v638_v45 = vpop.f32.mrb[1].mxu1 }
 0x1b2   : > { %830 = vst [vmem:[%s1480_s8 + $0x8] sm:$0xff] %v814_v43  ;;  %v823_v46 = vsel %vm812_vm8, %v806_v44, 0.0  ;;  %v804_v47 = vsel %vm795_vm6, %v638_v45, %v764_v28  ;;  %v1001_v48 = vpop.f32.mrb[2].mxu1 }
 0x1b3   : > { %839 = vst [vmem:[%s1480_s8 + $0x50] sm:$0xff] %v823_v46  ;;  %v821_v49 = vsel %vm812_vm8, %v804_v47, 0.0  ;;  %v807_v50 = vsel %vm795_vm6, %v1001_v48, %v770_v42  ;;  %v641_v51 = vpop.f32.mrb[3].mxu1 }
 0x1b4   : > { %837 = vst [vmem:[%s1480_s8 + $0x40] sm:$0xff] %v821_v49  ;;  %v824_v52 = vsel %vm812_vm8, %v807_v50, 0.0  ;;  %v805_v53 = vsel %vm795_vm6, %v641_v51, %v766_v29 }
 0x1b5   : > { %840 = vst [vmem:[%s1480_s8 + $0x58] sm:$0xff] %v824_v52  ;;  %v822_v54 = vsel %vm812_vm8, %v805_v53, 0.0 }
 0x1b6   : > { %838 = vst [vmem:[%s1480_s8 + $0x48] sm:$0xff] %v822_v54 }
 0x1e2   : > { %v996_v57 = vpop.f32.mrb[4].mxu0 }
 0x1e3   : > { %v802_v58 = vsel %vm795_vm6, %v996_v57, %v760_v26  ;;  %v622_v59 = vpop.f32.mrb[5].mxu0 }
 0x1e4   : > { %v819_v61 = vsel %vm812_vm8, %v802_v58, 0.0  ;;  %v800_v62 = vsel %vm795_vm6, %v622_v59, %v756_v23  ;;  %v997_v63 = vpop.f32.mrb[6].mxu0 }
 0x1e5   : > { %835 = vst [vmem:[%s1480_s8 + $0x30] sm:$0xff] %v819_v61  ;;  %v817_v1 = vsel %vm812_vm8, %v800_v62, 0.0  ;;  %v803_v60 = vsel %vm795_vm6, %v997_v63, %v762_v27  ;;  %v625_v2 = vpop.f32.mrb[7].mxu0 }
 0x1e6   : > { %833 = vst [vmem:[%s1480_s8 + $0x20] sm:$0xff] %v817_v1  ;;  %v820_v3 = vsel %vm812_vm8, %v803_v60, 0.0  ;;  %v801_v4 = vsel %vm795_vm6, %v625_v2, %v758_v25  ;;  %v1004_v5 = vpop.f32.mrb[4].mxu1 }
 0x1e7   : > { %836 = vst [vmem:[%s1480_s8 + $0x38] sm:$0xff] %v820_v3  ;;  %v818_v7 = vsel %vm812_vm8, %v801_v4, 0.0  ;;  %v810_v8 = vsel %vm795_vm6, %v1004_v5, %v776_v0  ;;  %v654_v9 = vpop.f32.mrb[5].mxu1 }
 0x1e8   : > { %834 = vst [vmem:[%s1480_s8 + $0x28] sm:$0xff] %v818_v7  ;;  %v827_v10 = vsel %vm812_vm8, %v810_v8, 0.0  ;;  %v808_v11 = vsel %vm795_vm6, %v654_v9, %v772_v55  ;;  %v1005_v12 = vpop.f32.mrb[6].mxu1 }
 0x1e9   : > { %843 = vst [vmem:[%s1480_s8 + $0x70] sm:$0xff] %v827_v10  ;;  %v825_v13 = vsel %vm812_vm8, %v808_v11, 0.0  ;;  %v811_v14 = vsel %vm795_vm6, %v1005_v12, %v778_v6  ;;  %v657_v15 = vpop.f32.mrb[7].mxu1 }
 0x1ea   : > { %841 = vst [vmem:[%s1480_s8 + $0x60] sm:$0xff] %v825_v13  ;;  %v828_v16 = vsel %vm812_vm8, %v811_v14, 0.0  ;;  %v809_v17 = vsel %vm795_vm6, %v657_v15, %v774_v56 }
 0x1eb   : > { %844 = vst [vmem:[%s1480_s8 + $0x78] sm:$0xff] %v828_v16  ;;  %v826_v18 = vsel %vm812_vm8, %v809_v17, 0.0 }
 0x1ec   : > { %842 = vst [vmem:[%s1480_s8 + $0x68] sm:$0xff] %v826_v18 }
 0x1ed   : > { %1086 = shalt.err (!%p1083_p3)
}
 0x1ee   : > { %s1087_s23 = scalar_lea.hbm %s1526_s12, 2048  ;;  %s1091_s30 = scalar_lea.hbm %s1584_s5, 4096 }
 0x1ef   : > { %p1088_p4 = scmp.ne.s32.totalorder %s1526_s12, %s1087_s23  ;;  %p1092_p9 = scmp.lt.u32.totalorder %s1526_s12, %s1584_s5 }
 0x1f0   : > { %p1093_p10 = scmp.lt.u32.totalorder %s1091_s30, %s1087_s23  ;;  %p1095_p12 = scmp.lt.u32.totalorder %s1087_s23, %s1526_s12 }
 0x1f1   : > { %p1089_p7 = pnand %p1088_p4, %p1213_p5 }
 0x1f2   : > { %p1094_p11 = por %p1093_p10, %p1092_p9 }
 0x1f3   : > { %p1090_p8 = pneg %p1089_p7 }
 0x1f4   : > { %p1096_p13 = por %p1095_p12, %p1094_p11 }
 0x1f6   : > { %p1097_p0 = pnand %p1096_p13, %p1090_p8 }
 0x1f8   : > { %1100 = shalt.err (!%p1097_p0)
}
 0x1f9   : > { %s1143_s8 = smov 128   ;;  %s1144_s9 = smov 8  }
 0x1fa   : > { %1012 = dma.vmem_to_hbm [thread:$0]  (%p1213_p5), %s1528_s10, 2048, %s1526_s12, %s1538_s13, %s1143_s8, %s1143_s8, %s1144_s9  }
 0x1fb PF: > { %p1018_p1 = scmp.ge.s32.totalorder %s1135_s21, 2  ;;  %s874_s22 = sand.u32 1, %s1123_s18  }
 0x1fc   : > { %s875_s11 = scalar_lea.sflag [#allocation3], %s874_s22 }
 0x1fd   : > { %p1015_p2 = pnand %p1018_p1, %p1217_p6 }
 0x1ff   : > { %1118 = dma.done.wait (!%p1015_p2), %s875_s11, 2048  }
 0x200   : > { %1120 = vsyncadd (!%p1015_p2), %s875_s11, 4294965248  ;;  %p15_p3 = scmp.ge.s32.totalorder %s1200_s24, 4   ;;  %s1592_s18 = smov %s1127_s19 }
 0x201   : > { %s1593_s19 = smov %s1131_s20  ;;  %s1594_s20 = smov %s1211_s27 }
 0x202   : > { %s1595_s21 = smov %s1200_s24  ;;  %17 = sbr.rel (!%p15_p3) target bundleno = 3 (0x3), region = 78 }
 0x209   :  { %880 = vsyncpa [#allocation3], 1 }
 0x20a   :  { %882 = vsyncpa [#allocation3 + $0x1], 1 }

</bundles_post_ra>
